<compile_context>
chip_gen: v7x
topology: tpu7x:2x2x1
jax: 0.10.0
libtpu: 0.0.40
codegen_flags: <defaults>
</compile_context>

<pallas_src>
import jax
import jax.numpy as jnp
from jax.experimental import pallas as pl
from jax.experimental.pallas import tpu as pltpu


def _vit_embed_kernel(patch_ref, w_ref, pos_ref, o_ref):
    """One grid step = Bt images.

    patch_ref: (Bt*S_pad, K) merged im2col rows; each image's S_pad-row slab starts at a
               16-aligned sublane offset; row 0 of each slab is the all-zero cls slot,
               rows S..S_pad are alignment padding.
    w_ref:     (K, D)     flattened conv weight (grid-invariant).
    pos_ref:   (S_pad, D) position table, cls token folded into row 0, zero-padded tail
                          (grid-invariant, stored in compute dtype).
    o_ref:     (Bt, S, D) output tokens.
    """
    Bt, S, D = o_ref.shape
    Sp = pos_ref.shape[0]
    # Single merged MXU matmul over all Bt images, f32 accumulation.
    emb = jnp.dot(patch_ref[...], w_ref[...], preferred_element_type=jnp.float32)
    # (Bt*Sp, D) -> (Bt, Sp, D): Sp is a multiple of 16, so the split is layout-trivial.
    tokens = emb.reshape(Bt, Sp, D) + pos_ref[...].astype(jnp.float32)[None]
    # Drop the alignment-pad rows at the store; cast exactly once.
    o_ref[...] = tokens[:, :S, :].astype(o_ref.dtype)


def _vmem_limit_bytes():
    """Per-generation scoped-VMEM limit: <=40 MiB on 64-MiB parts (v7x), 64 MiB on
    128-MiB parts (v5e/v6e); conservative if the hardware query fails."""
    try:
        cap = int(pltpu.get_tpu_info().vmem_capacity_bytes)
    except Exception:
        cap = 64 << 20  # unknown -> assume the smallest (v7x-sized) part
    return (40 << 20) if cap <= (64 << 20) else (64 << 20)


def vit_embeddings(x_nchw, conv_weight, cls_token, position_embedding, patch_size,
                   *, compute_dtype=jnp.bfloat16, out_dtype=None, batch_tile=8):
    """Forward pass of ViTEmbeddings (eval mode: dropout == identity).

    x_nchw: (B, C, H, W); conv_weight: (D, C, P, P) (bias=False, as in the module);
    cls_token: (1, 1, D); position_embedding: (1, N+1, D).

    compute_dtype: dtype fed to the MXU / patch stream (default bf16). The matmul
      accumulates and the position add happens in f32 regardless.
    out_dtype: stored token dtype (default x_nchw.dtype). Pass bf16 for bf16 consumers.
    batch_tile: max images per grid step (the largest divisor of B <= batch_tile is used,
      so no batch padding or output slicing is ever needed).
    """
    B, C, H, W = x_nchw.shape
    D = conv_weight.shape[0]
    P = patch_size
    assert H % P == 0 and W % P == 0, "image size must be a multiple of patch size"
    nh, nw = H // P, W // P
    N = nh * nw
    K = C * P * P
    S = N + 1
    if compute_dtype is None:
        compute_dtype = x_nchw.dtype
    if out_dtype is None:
        out_dtype = x_nchw.dtype

    # Sequence rows padded to a multiple of 16 (covers f32 and bf16 sublane packing) so
    # per-image slabs in the merged layout are tile-aligned. The OUTPUT stays unpadded.
    S_pad = -(-S // 16) * 16
    # Largest batch tile that divides B.
    Bt = max(d for d in range(1, min(batch_tile, B) + 1) if B % d == 0)

    # --- host glue: one write pass for the patch tensor ----------------------
    # im2col in compute_dtype (bf16 halves the stream), feature order (c, ph, pw)
    # matching the Conv2d weight flattening, written straight into a zero (B, S_pad, K)
    # buffer at row offset 1: the all-zero cls slot and the alignment rows come from the
    # same copy (no separate jnp.pad pass).
    x = x_nchw.astype(compute_dtype)
    patches = x.reshape(B, C, nh, P, nw, P).transpose(0, 2, 4, 1, 3, 5).reshape(B, N, K)
    patches = jax.lax.dynamic_update_slice(
        jnp.zeros((B, S_pad, K), compute_dtype), patches, (0, 1, 0))
    patches = patches.reshape(B * S_pad, K)        # free reshape: merged 2-D row layout

    w_flat = conv_weight.reshape(D, K).T.astype(compute_dtype)       # (K, D)

    # Batch-invariant cls work hoisted out of the grid: fold the cls token into row 0 of
    # the position table (patch row 0 contributes exactly 0). Stored in compute_dtype;
    # upcast and added in f32 inside the kernel.
    pos_f32 = position_embedding.astype(jnp.float32)[0].at[0].add(
        cls_token.astype(jnp.float32)[0, 0])                         # (S, D) f32
    pos_cls = jnp.zeros((S_pad, D), compute_dtype).at[:S, :].set(
        pos_f32.astype(compute_dtype))                               # (S_pad, D)

    grid = (B // Bt,)

    def call(single_buffer_residents):
        res_kw = {}
        if single_buffer_residents and hasattr(pl, "Buffered"):
            # Grid-invariant blocks only need one buffer; saves (K*D + S_pad*D) of VMEM
            # (headroom that matters under v7x's 64 MiB).
            res_kw = dict(pipeline_mode=pl.Buffered(1))
        return pl.pallas_call(
            _vit_embed_kernel,
            out_shape=jax.ShapeDtypeStruct((B, S, D), out_dtype),
            grid_spec=pltpu.PrefetchScalarGridSpec(
                num_scalar_prefetch=0,
                grid=grid,
                in_specs=[
                    pl.BlockSpec((Bt * S_pad, K), lambda b: (b, 0)),       # Bt images/step
                    pl.BlockSpec((K, D), lambda b: (0, 0), **res_kw),      # resident weight
                    pl.BlockSpec((S_pad, D), lambda b: (0, 0), **res_kw),  # resident pos(+cls)
                ],
                out_specs=pl.BlockSpec((Bt, S, D), lambda b: (b, 0, 0)),
            ),
            compiler_params=pltpu.CompilerParams(
                dimension_semantics=("parallel",),      # megacore-shards batch steps (v7x)
                vmem_limit_bytes=_vmem_limit_bytes(),
            ),
        )(patches, w_flat, pos_cls)

    try:
        return call(True)
    except Exception:
        # pipeline_mode=pl.Buffered(1) not supported on this jax version/backend.
        return call(False)


def _reference(x_nchw, conv_weight, cls_token, position_embedding, patch_size):
    """Pure-JAX reference mirroring the PyTorch forward (eval mode)."""
    B, C, H, W = x_nchw.shape
    D = conv_weight.shape[0]
    P = patch_size
    nh, nw = H // P, W // P
    patches = x_nchw.reshape(B, C, nh, P, nw, P).transpose(0, 2, 4, 1, 3, 5)
    patches = patches.reshape(B, nh * nw, C * P * P)
    emb = patches @ conv_weight.reshape(D, -1).T                     # (B, N, D)
    cls = jnp.broadcast_to(cls_token, (B, 1, D))
    return jnp.concatenate([cls, emb], axis=1) + position_embedding


if __name__ == "__main__":
    # Small, module-consistent shapes: image 16x16, patch 4, 4 channels, em_dim 32.
    image_size, patch_size, num_channels, em_dim, batch = 16, 4, 4, 32, 4
    num_patches = (image_size // patch_size) ** 2   # 16 -> seq = 17

    key = jax.random.PRNGKey(0)
    k_x, k_w, k_cls, k_pos = jax.random.split(key, 4)

    x = jax.random.normal(k_x, (batch, num_channels, image_size, image_size),
                          dtype=jnp.float32)
    conv_w = 0.02 * jax.random.normal(
        k_w, (em_dim, num_channels, patch_size, patch_size), dtype=jnp.float32)
    cls_tok = 0.02 * jax.random.normal(k_cls, (1, 1, em_dim), dtype=jnp.float32)
    pos_emb = 0.02 * jax.random.normal(
        k_pos, (1, num_patches + 1, em_dim), dtype=jnp.float32)

    ref = _reference(x, conv_w, cls_tok, pos_emb, patch_size)

    # 1) Default path: bf16 MXU inputs, f32 accumulate + f32 pos add, f32 output,
    #    all 4 images in one grid step (Bt=4).
    out = jax.block_until_ready(
        vit_embeddings(x, conv_w, cls_tok, pos_emb, patch_size))
    assert out.shape == (batch, num_patches + 1, em_dim)
    assert out.dtype == jnp.float32
    assert jnp.allclose(out, ref, atol=5e-2, rtol=5e-2)

    # 2) Multi-step grid with multi-image blocks (Bt=2, grid=(2,)).
    out2 = jax.block_until_ready(
        vit_embeddings(x, conv_w, cls_tok, pos_emb, patch_size, batch_tile=2))
    assert jnp.allclose(out2, ref, atol=5e-2, rtol=5e-2)

    # 3) f32 compute path, one image per step: strict parity with the reference.
    out32 = jax.block_until_ready(
        vit_embeddings(x, conv_w, cls_tok, pos_emb, patch_size,
                       compute_dtype=jnp.float32, batch_tile=1))
    assert jnp.allclose(out32, ref, atol=1e-5, rtol=1e-5)

    # 4) bf16 output stream for bf16 consumers.
    out_bf16 = jax.block_until_ready(
        vit_embeddings(x, conv_w, cls_tok, pos_emb, patch_size,
                       out_dtype=jnp.bfloat16))
    assert out_bf16.dtype == jnp.bfloat16
    assert jnp.allclose(out_bf16.astype(jnp.float32), ref, atol=5e-2, rtol=5e-2)

    print("KERNEL_OK")
</pallas_src>

<mosaic_0001>
module attributes {stable_mosaic.version = 11 : i64} {
  func.func @_vit_embed_kernel(%arg0: i32, %arg1: memref<128x64xbf16, #tpu.memory_space<vmem>>, %arg2: memref<64x32xbf16, #tpu.memory_space<vmem>>, %arg3: memref<32x32xbf16, #tpu.memory_space<vmem>>, %arg4: memref<4x17x32xf32, #tpu.memory_space<vmem>>) attributes {dimension_semantics = [#tpu.dimension_semantics<parallel>], iteration_bounds = array<i64: 1>, scalar_prefetch = 0 : i64, scratch_operands = 0 : i64, tpu.core_type = #tpu.core_type<tc>, window_params = [{transform_indices = @transform_0, window_bounds = array<i64: 128, 64>}, {pipeline_mode = #tpu.pipeline_mode<synchronous>, transform_indices = @transform_1, window_bounds = array<i64: 64, 32>}, {pipeline_mode = #tpu.pipeline_mode<synchronous>, transform_indices = @transform_2, window_bounds = array<i64: 32, 32>}, {transform_indices = @transform_3, window_bounds = array<i64: 4, 17, 32>}]} {
    %c0 = arith.constant 0 : index
    %c0_0 = arith.constant 0 : index
    %0 = vector.load %arg1[%c0, %c0_0] : memref<128x64xbf16, #tpu.memory_space<vmem>>, vector<128x64xbf16>
    %c0_1 = arith.constant 0 : index
    %c0_2 = arith.constant 0 : index
    %1 = vector.load %arg2[%c0_1, %c0_2] : memref<64x32xbf16, #tpu.memory_space<vmem>>, vector<64x32xbf16>
    %cst = arith.constant dense<0.000000e+00> : vector<128x32xf32>
    %2 = tpu.matmul %0, %1, %cst {dimension_numbers = #tpu.dot_dimension_numbers<[1], [0], [0], [1], [0, 0, 1, 1], [], []>} : vector<128x64xbf16>, vector<64x32xbf16>, vector<128x32xf32> -> vector<128x32xf32>
    %3 = vector.shape_cast %2 : vector<128x32xf32> to vector<4x32x32xf32>
    %c0_3 = arith.constant 0 : index
    %c0_4 = arith.constant 0 : index
    %4 = vector.load %arg3[%c0_3, %c0_4] : memref<32x32xbf16, #tpu.memory_space<vmem>>, vector<32x32xbf16>
    %5 = arith.extf %4 : vector<32x32xbf16> to vector<32x32xf32>
    %6 = vector.shape_cast %5 : vector<32x32xf32> to vector<1x32x32xf32>
    %7 = vector.broadcast %6 : vector<1x32x32xf32> to vector<4x32x32xf32>
    %8 = arith.addf %3, %7 : vector<4x32x32xf32>
    %9 = vector.extract_strided_slice %8 {offsets = [0, 0, 0], sizes = [4, 17, 32], strides = [1, 1, 1]} : vector<4x32x32xf32> to vector<4x17x32xf32>
    %c0_5 = arith.constant 0 : index
    %c0_6 = arith.constant 0 : index
    %c0_7 = arith.constant 0 : index
    %10 = vector.load %arg4[%c0_5, %c0_6, %c0_7] : memref<4x17x32xf32, #tpu.memory_space<vmem>>, vector<4x17x32xf32>
    tpu.vector_store %arg4[%c0_5, %c0_6, %c0_7], %9 {strides = array<i32>} : memref<4x17x32xf32, #tpu.memory_space<vmem>>, vector<4x17x32xf32>,
    return
  }
  func.func @transform_0(%arg0: i32) -> (i32, i32) {
    %c0_i32 = arith.constant 0 : i32
    %c0_i32_0 = arith.constant 0 : i32
    return %arg0, %c0_i32 : i32, i32
  }
  func.func @transform_1(%arg0: i32) -> (i32, i32) {
    %c0_i32 = arith.constant 0 : i32
    %c0_i32_0 = arith.constant 0 : i32
    %c0_i32_1 = arith.constant 0 : i32
    return %c0_i32, %c0_i32_0 : i32, i32
  }
  func.func @transform_2(%arg0: i32) -> (i32, i32) {
    %c0_i32 = arith.constant 0 : i32
    %c0_i32_0 = arith.constant 0 : i32
    %c0_i32_1 = arith.constant 0 : i32
    return %c0_i32, %c0_i32_0 : i32, i32
  }
  func.func @transform_3(%arg0: i32) -> (i32, i32, i32) {
    %c0_i32 = arith.constant 0 : i32
    %c0_i32_0 = arith.constant 0 : i32
    %c0_i32_1 = arith.constant 0 : i32
    return %arg0, %c0_i32, %c0_i32_0 : i32, i32, i32
  }
}

module attributes {stable_mosaic.version = 11 : i64} {
  func.func @_vit_embed_kernel(%arg0: i32, %arg1: memref<128x64xbf16, #tpu.memory_space<vmem>>, %arg2: memref<64x32xbf16, #tpu.memory_space<vmem>>, %arg3: memref<32x32xbf16, #tpu.memory_space<vmem>>, %arg4: memref<4x17x32xf32, #tpu.memory_space<vmem>>) attributes {dimension_semantics = [#tpu.dimension_semantics<parallel>], iteration_bounds = array<i64: 1>, scalar_prefetch = 0 : i64, scratch_operands = 0 : i64, tpu.core_type = #tpu.core_type<tc>, window_params = [{transform_indices = @transform_0, window_bounds = array<i64: 128, 64>}, {pipeline_mode = #tpu.pipeline_mode<synchronous>, transform_indices = @transform_1, window_bounds = array<i64: 64, 32>}, {pipeline_mode = #tpu.pipeline_mode<synchronous>, transform_indices = @transform_2, window_bounds = array<i64: 32, 32>}, {transform_indices = @transform_3, window_bounds = array<i64: 4, 17, 32>}]} {
    %c0 = arith.constant 0 : index
    %c0_0 = arith.constant 0 : index
    %0 = vector.load %arg1[%c0, %c0_0] : memref<128x64xbf16, #tpu.memory_space<vmem>>, vector<128x64xbf16>
    %c0_1 = arith.constant 0 : index
    %c0_2 = arith.constant 0 : index
    %1 = vector.load %arg2[%c0_1, %c0_2] : memref<64x32xbf16, #tpu.memory_space<vmem>>, vector<64x32xbf16>
    %cst = arith.constant dense<0.000000e+00> : vector<128x32xf32>
    %2 = tpu.matmul %0, %1, %cst {dimension_numbers = #tpu.dot_dimension_numbers<[1], [0], [0], [1], [0, 0, 1, 1], [], []>} : vector<128x64xbf16>, vector<64x32xbf16>, vector<128x32xf32> -> vector<128x32xf32>
    %3 = vector.shape_cast %2 : vector<128x32xf32> to vector<4x32x32xf32>
    %c0_3 = arith.constant 0 : index
    %c0_4 = arith.constant 0 : index
    %4 = vector.load %arg3[%c0_3, %c0_4] : memref<32x32xbf16, #tpu.memory_space<vmem>>, vector<32x32xbf16>
    %5 = arith.extf %4 : vector<32x32xbf16> to vector<32x32xf32>
    %6 = vector.shape_cast %5 : vector<32x32xf32> to vector<1x32x32xf32>
    %7 = vector.broadcast %6 : vector<1x32x32xf32> to vector<4x32x32xf32>
    %8 = arith.addf %3, %7 : vector<4x32x32xf32>
    %9 = vector.extract_strided_slice %8 {offsets = [0, 0, 0], sizes = [4, 17, 32], strides = [1, 1, 1]} : vector<4x32x32xf32> to vector<4x17x32xf32>
    %c0_5 = arith.constant 0 : index
    %c0_6 = arith.constant 0 : index
    %c0_7 = arith.constant 0 : index
    %10 = vector.load %arg4[%c0_5, %c0_6, %c0_7] : memref<4x17x32xf32, #tpu.memory_space<vmem>>, vector<4x17x32xf32>
    tpu.vector_store %arg4[%c0_5, %c0_6, %c0_7], %9 {strides = array<i32>} : memref<4x17x32xf32, #tpu.memory_space<vmem>>, vector<4x17x32xf32>,
    return
  }
  func.func @transform_0(%arg0: i32) -> (i32, i32) {
    %c0_i32 = arith.constant 0 : i32
    %c0_i32_0 = arith.constant 0 : i32
    return %arg0, %c0_i32 : i32, i32
  }
  func.func @transform_1(%arg0: i32) -> (i32, i32) {
    %c0_i32 = arith.constant 0 : i32
    %c0_i32_0 = arith.constant 0 : i32
    %c0_i32_1 = arith.constant 0 : i32
    return %c0_i32, %c0_i32_0 : i32, i32
  }
  func.func @transform_2(%arg0: i32) -> (i32, i32) {
    %c0_i32 = arith.constant 0 : i32
    %c0_i32_0 = arith.constant 0 : i32
    %c0_i32_1 = arith.constant 0 : i32
    return %c0_i32, %c0_i32_0 : i32, i32
  }
  func.func @transform_3(%arg0: i32) -> (i32, i32, i32) {
    %c0_i32 = arith.constant 0 : i32
    %c0_i32_0 = arith.constant 0 : i32
    %c0_i32_1 = arith.constant 0 : i32
    return %arg0, %c0_i32, %c0_i32_0 : i32, i32, i32
  }
}

</mosaic_0001>

<bundles_post_ra>
// kernel: tpu_custom_call.1
= control target key start
LH: loop header
LB: loop body
LE: loop exit
PB: predicated region body
PF: predicated region fallthrough
CT: control target
= control target key end

     0   :  { %vm103_vm0 = vcmask 523264   ;;  %vm242_vm1 = vcmask 253952   ;;  %vm239_vm2 = vcmask 261120   ;;  %s455_s1 = inlined_call_operand.vmem [shape: bf16[64,32], index: 1, kind: input, shape index: {}]   ;;  %s456_s0 = inlined_call_operand.vmem [shape: bf16[128,64], index: 0, kind: input, shape index: {}]   ;;  %s457_s2 = inlined_call_operand.vmem [shape: bf16[32,32], index: 2, kind: input, shape index: {}]   ;;  %s458_s3 = inlined_call_operand.vmem [shape: f32[4,17,32], index: 3, kind: output, shape index: {}]  }
   0x1   :  { %v325_v0 = vld [vmem:[%s455_s1] sm:$0xff]   ;;  %v326_v1 = vld [vmem:[%s455_s1 + $0x8] sm:$0xff]   ;;  %v327_v2 = vld [vmem:[%s455_s1 + $0x10] sm:$0xff]  }
   0x2   :  { %293 = vmatprep.subr.bf16.mxu0 %v325_v0  ;;  %317 = vmatprep.subr.bf16.mxu1 %v325_v0  ;;  %v329_v3 = vld [vmem:[%s456_s0] sm:$0xff]   ;;  %v328_v5 = vld [vmem:[%s455_s1 + $0x18] sm:$0xff]   ;;  %v331_v6 = vld [vmem:[%s456_s0 + $0x8] sm:$0xff]  }
   0x3   :  { %294 = vmatpush3.bf16.msra.mxu0 %v325_v0  ;;  %321 = vmatpush3.bf16.msra.mxu1 %v325_v0  ;;  %v330_v4 = vld [vmem:[%s456_s0 + $0x20] sm:$0xff]   ;;  %v332_v7 = vld [vmem:[%s456_s0 + $0x28] sm:$0xff]   ;;  %v333_v8 = vld [vmem:[%s456_s0 + $0x10] sm:$0xff]  }
   0x4   :  { %295 = vmatprep.subr.bf16.mxu0 %v326_v1  ;;  %318 = vmatprep.subr.bf16.mxu1 %v326_v1  ;;  %v334_v9 = vld [vmem:[%s456_s0 + $0x30] sm:$0xff]   ;;  %v335_v10 = vld [vmem:[%s456_s0 + $0x18] sm:$0xff]   ;;  %v223_v12 = vld [vmem:[%s457_s2 + $0x8] sm:$0xf] }
   0x5   :  { %301 = vmatprep.mubr.msk.bf16.mxu0 %vm103_vm0, %v329_v3  ;;  %309 = vmatprep.mubr.msk.bf16.mxu1 %vm103_vm0, %v330_v4  ;;  %v336_v11 = vld [vmem:[%s456_s0 + $0x38] sm:$0xff]   ;;  %v278_v13 = vld [vmem:[%s457_s2] sm:$0xff]   ;;  %v226_v14 = vunpack.c.l.bf16 %v223_v12 }
   0x6   :  { %v279_v15 = vunpack.c.l.bf16 %v278_v13  ;;  %v280_v18 = vunpack.c.h.bf16 %v278_v13 }
   0x7   :  { %296 = vmatpush3.bf16.msra.mxu0 %v326_v1  ;;  %322 = vmatpush3.bf16.msra.mxu1 %v326_v1 }
   0x8   :  { %297 = vmatprep.subr.bf16.mxu0 %v327_v2  ;;  %319 = vmatprep.subr.bf16.mxu1 %v327_v2 }
   0xb   :  { %298 = vmatpush3.bf16.msra.mxu0 %v327_v2  ;;  %323 = vmatpush3.bf16.msra.mxu1 %v327_v2 }
   0xc   :  { %299 = vmatprep.subr.bf16.mxu0 %v328_v5  ;;  %320 = vmatprep.subr.bf16.mxu1 %v328_v5 }
   0xf   :  { %300 = vmatpush3.bf16.msra.mxu0 %v328_v5  ;;  %324 = vmatpush3.bf16.msra.mxu1 %v328_v5 }
  0x12   :  { %302 = vmatmul.mubr.msk.bf16.vlgmr.msra.gmra.mrb[0].mxu0 %vm103_vm0, %v331_v6  ;;  %310 = vmatmul.mubr.msk.bf16.vlgmr.msra.gmra.mrb[0].mxu1 %vm103_vm0, %v332_v7 }
  0x13   :  { %305 = vmatprep.mubr.msk.bf16.mxu0 %vm103_vm0, %v333_v8  ;;  %313 = vmatprep.mubr.msk.bf16.mxu1 %vm103_vm0, %v334_v9 }
  0x1a   :  { %306 = vmatmul.mubr.msk.bf16.gmra.mrb[4].mxu0 %vm103_vm0, %v335_v10  ;;  %314 = vmatmul.mubr.msk.bf16.gmra.mrb[4].mxu1 %vm103_vm0, %v336_v11 }
  0xe5   :  { %v303_v16 = vpop.f32.mrb[0].mxu0  ;;  %v311_v17 = vpop.f32.mrb[0].mxu1 }
  0xe6   :  { %v229_v19 = vadd.f32 %v303_v16, %v226_v14  ;;  %v235_v20 = vadd.f32 %v311_v17, %v226_v14  ;;  %v162_v21 = vpop.f32.mrb[1].mxu0  ;;  %v192_v22 = vpop.f32.mrb[1].mxu1 }
  0xe7   :  { %v227_v23 = vadd.f32 %v279_v15, %v162_v21  ;;  %v233_v24 = vadd.f32 %v279_v15, %v192_v22  ;;  %v304_v25 = vpop.f32.mrb[2].mxu0  ;;  %v312_v26 = vpop.f32.mrb[2].mxu1 }
  0xe8   :  { %243 = vst.msk [vmem:[%s458_s3 + $0x10] sm:$0x1] %vm242_vm1, %v229_v19  ;;  %249 = vst.msk [vmem:[%s458_s3 + $0x40] sm:$0x1] %vm242_vm1, %v235_v20  ;;  %v165_v27 = vpop.f32.mrb[3].mxu0  ;;  %v195_v28 = vpop.f32.mrb[3].mxu1 }
  0xe9   :  { %240 = vst.msk [vmem:[%s458_s3] sm:$0xff] %vm239_vm2, %v227_v23  ;;  %247 = vst.msk [vmem:[%s458_s3 + $0x30] sm:$0xff] %vm239_vm2, %v233_v24  ;;  %v228_v29 = vadd.f32 %v280_v18, %v165_v27  ;;  %v234_v30 = vadd.f32 %v280_v18, %v195_v28 }
  0xeb   :  { %241 = vst.msk [vmem:[%s458_s3 + $0x8] sm:$0xff] %vm239_vm2, %v228_v29  ;;  %248 = vst.msk [vmem:[%s458_s3 + $0x38] sm:$0xff] %vm239_vm2, %v234_v30 }
  0xed   :  { %v307_v31 = vpop.f32.mrb[4].mxu0  ;;  %v315_v32 = vpop.f32.mrb[4].mxu1 }
  0xee   :  { %v232_v33 = vadd.f32 %v307_v31, %v226_v14  ;;  %v238_v34 = vadd.f32 %v315_v32, %v226_v14  ;;  %v177_v35 = vpop.f32.mrb[5].mxu0  ;;  %v207_v36 = vpop.f32.mrb[5].mxu1 }
  0xef   :  { %v230_v37 = vadd.f32 %v279_v15, %v177_v35  ;;  %v236_v38 = vadd.f32 %v279_v15, %v207_v36  ;;  %v308_v39 = vpop.f32.mrb[6].mxu0  ;;  %v316_v40 = vpop.f32.mrb[6].mxu1 }
  0xf0   :  { %246 = vst.msk [vmem:[%s458_s3 + $0x28] sm:$0x1] %vm242_vm1, %v232_v33  ;;  %252 = vst.msk [vmem:[%s458_s3 + $0x58] sm:$0x1] %vm242_vm1, %v238_v34  ;;  %v180_v41 = vpop.f32.mrb[7].mxu0  ;;  %v210_v42 = vpop.f32.mrb[7].mxu1 }
  0xf1   :  { %244 = vst.msk [vmem:[%s458_s3 + $0x18] sm:$0xff] %vm239_vm2, %v230_v37  ;;  %250 = vst.msk [vmem:[%s458_s3 + $0x48] sm:$0xff] %vm239_vm2, %v236_v38  ;;  %v231_v43 = vadd.f32 %v280_v18, %v180_v41  ;;  %v237_v44 = vadd.f32 %v280_v18, %v210_v42 }
  0xf3   :  { %245 = vst.msk [vmem:[%s458_s3 + $0x20] sm:$0xff] %vm239_vm2, %v231_v43  ;;  %251 = vst.msk [vmem:[%s458_s3 + $0x50] sm:$0xff] %vm239_vm2, %v237_v44 }

// kernel: tpu_custom_call.1
= control target key start
LH: loop header
LB: loop body
LE: loop exit
PB: predicated region body
PF: predicated region fallthrough
CT: control target
= control target key end

     0   :  { %vm103_vm0 = vcmask 523264   ;;  %vm242_vm1 = vcmask 253952   ;;  %vm239_vm2 = vcmask 261120   ;;  %s455_s1 = inlined_call_operand.vmem [shape: bf16[64,32], index: 1, kind: input, shape index: {}]   ;;  %s456_s0 = inlined_call_operand.vmem [shape: bf16[128,64], index: 0, kind: input, shape index: {}]   ;;  %s457_s2 = inlined_call_operand.vmem [shape: bf16[32,32], index: 2, kind: input, shape index: {}]   ;;  %s458_s3 = inlined_call_operand.vmem [shape: f32[4,17,32], index: 3, kind: output, shape index: {}]  }
   0x1   :  { %v325_v0 = vld [vmem:[%s455_s1] sm:$0xff]   ;;  %v326_v1 = vld [vmem:[%s455_s1 + $0x8] sm:$0xff]   ;;  %v327_v2 = vld [vmem:[%s455_s1 + $0x10] sm:$0xff]  }
   0x2   :  { %293 = vmatprep.subr.bf16.mxu0 %v325_v0  ;;  %317 = vmatprep.subr.bf16.mxu1 %v325_v0  ;;  %v329_v3 = vld [vmem:[%s456_s0] sm:$0xff]   ;;  %v328_v5 = vld [vmem:[%s455_s1 + $0x18] sm:$0xff]   ;;  %v331_v6 = vld [vmem:[%s456_s0 + $0x8] sm:$0xff]  }
   0x3   :  { %294 = vmatpush3.bf16.msra.mxu0 %v325_v0  ;;  %321 = vmatpush3.bf16.msra.mxu1 %v325_v0  ;;  %v330_v4 = vld [vmem:[%s456_s0 + $0x20] sm:$0xff]   ;;  %v332_v7 = vld [vmem:[%s456_s0 + $0x28] sm:$0xff]   ;;  %v333_v8 = vld [vmem:[%s456_s0 + $0x10] sm:$0xff]  }
   0x4   :  { %295 = vmatprep.subr.bf16.mxu0 %v326_v1  ;;  %318 = vmatprep.subr.bf16.mxu1 %v326_v1  ;;  %v334_v9 = vld [vmem:[%s456_s0 + $0x30] sm:$0xff]   ;;  %v335_v10 = vld [vmem:[%s456_s0 + $0x18] sm:$0xff]   ;;  %v223_v12 = vld [vmem:[%s457_s2 + $0x8] sm:$0xf] }
   0x5   :  { %301 = vmatprep.mubr.msk.bf16.mxu0 %vm103_vm0, %v329_v3  ;;  %309 = vmatprep.mubr.msk.bf16.mxu1 %vm103_vm0, %v330_v4  ;;  %v336_v11 = vld [vmem:[%s456_s0 + $0x38] sm:$0xff]   ;;  %v278_v13 = vld [vmem:[%s457_s2] sm:$0xff]   ;;  %v226_v14 = vunpack.c.l.bf16 %v223_v12 }
   0x6   :  { %v279_v15 = vunpack.c.l.bf16 %v278_v13  ;;  %v280_v18 = vunpack.c.h.bf16 %v278_v13 }
   0x7   :  { %296 = vmatpush3.bf16.msra.mxu0 %v326_v1  ;;  %322 = vmatpush3.bf16.msra.mxu1 %v326_v1 }
   0x8   :  { %297 = vmatprep.subr.bf16.mxu0 %v327_v2  ;;  %319 = vmatprep.subr.bf16.mxu1 %v327_v2 }
   0xb   :  { %298 = vmatpush3.bf16.msra.mxu0 %v327_v2  ;;  %323 = vmatpush3.bf16.msra.mxu1 %v327_v2 }
   0xc   :  { %299 = vmatprep.subr.bf16.mxu0 %v328_v5  ;;  %320 = vmatprep.subr.bf16.mxu1 %v328_v5 }
   0xf   :  { %300 = vmatpush3.bf16.msra.mxu0 %v328_v5  ;;  %324 = vmatpush3.bf16.msra.mxu1 %v328_v5 }
  0x12   :  { %302 = vmatmul.mubr.msk.bf16.vlgmr.msra.gmra.mrb[0].mxu0 %vm103_vm0, %v331_v6  ;;  %310 = vmatmul.mubr.msk.bf16.vlgmr.msra.gmra.mrb[0].mxu1 %vm103_vm0, %v332_v7 }
  0x13   :  { %305 = vmatprep.mubr.msk.bf16.mxu0 %vm103_vm0, %v333_v8  ;;  %313 = vmatprep.mubr.msk.bf16.mxu1 %vm103_vm0, %v334_v9 }
  0x1a   :  { %306 = vmatmul.mubr.msk.bf16.gmra.mrb[4].mxu0 %vm103_vm0, %v335_v10  ;;  %314 = vmatmul.mubr.msk.bf16.gmra.mrb[4].mxu1 %vm103_vm0, %v336_v11 }
  0xe5   :  { %v303_v16 = vpop.f32.mrb[0].mxu0  ;;  %v311_v17 = vpop.f32.mrb[0].mxu1 }
  0xe6   :  { %v229_v19 = vadd.f32 %v303_v16, %v226_v14  ;;  %v235_v20 = vadd.f32 %v311_v17, %v226_v14  ;;  %v162_v21 = vpop.f32.mrb[1].mxu0  ;;  %v192_v22 = vpop.f32.mrb[1].mxu1 }
  0xe7   :  { %v227_v23 = vadd.f32 %v279_v15, %v162_v21  ;;  %v233_v24 = vadd.f32 %v279_v15, %v192_v22  ;;  %v304_v25 = vpop.f32.mrb[2].mxu0  ;;  %v312_v26 = vpop.f32.mrb[2].mxu1 }
  0xe8   :  { %243 = vst.msk [vmem:[%s458_s3 + $0x10] sm:$0x1] %vm242_vm1, %v229_v19  ;;  %249 = vst.msk [vmem:[%s458_s3 + $0x40] sm:$0x1] %vm242_vm1, %v235_v20  ;;  %v165_v27 = vpop.f32.mrb[3].mxu0  ;;  %v195_v28 = vpop.f32.mrb[3].mxu1 }
  0xe9   :  { %240 = vst.msk [vmem:[%s458_s3] sm:$0xff] %vm239_vm2, %v227_v23  ;;  %247 = vst.msk [vmem:[%s458_s3 + $0x30] sm:$0xff] %vm239_vm2, %v233_v24  ;;  %v228_v29 = vadd.f32 %v280_v18, %v165_v27  ;;  %v234_v30 = vadd.f32 %v280_v18, %v195_v28 }
  0xeb   :  { %241 = vst.msk [vmem:[%s458_s3 + $0x8] sm:$0xff] %vm239_vm2, %v228_v29  ;;  %248 = vst.msk [vmem:[%s458_s3 + $0x38] sm:$0xff] %vm239_vm2, %v234_v30 }
  0xed   :  { %v307_v31 = vpop.f32.mrb[4].mxu0  ;;  %v315_v32 = vpop.f32.mrb[4].mxu1 }
  0xee   :  { %v232_v33 = vadd.f32 %v307_v31, %v226_v14  ;;  %v238_v34 = vadd.f32 %v315_v32, %v226_v14  ;;  %v177_v35 = vpop.f32.mrb[5].mxu0  ;;  %v207_v36 = vpop.f32.mrb[5].mxu1 }
  0xef   :  { %v230_v37 = vadd.f32 %v279_v15, %v177_v35  ;;  %v236_v38 = vadd.f32 %v279_v15, %v207_v36  ;;  %v308_v39 = vpop.f32.mrb[6].mxu0  ;;  %v316_v40 = vpop.f32.mrb[6].mxu1 }
  0xf0   :  { %246 = vst.msk [vmem:[%s458_s3 + $0x28] sm:$0x1] %vm242_vm1, %v232_v33  ;;  %252 = vst.msk [vmem:[%s458_s3 + $0x58] sm:$0x1] %vm242_vm1, %v238_v34  ;;  %v180_v41 = vpop.f32.mrb[7].mxu0  ;;  %v210_v42 = vpop.f32.mrb[7].mxu1 }
  0xf1   :  { %244 = vst.msk [vmem:[%s458_s3 + $0x18] sm:$0xff] %vm239_vm2, %v230_v37  ;;  %250 = vst.msk [vmem:[%s458_s3 + $0x48] sm:$0xff] %vm239_vm2, %v236_v38  ;;  %v231_v43 = vadd.f32 %v280_v18, %v180_v41  ;;  %v237_v44 = vadd.f32 %v280_v18, %v210_v42 }
  0xf3   :  { %245 = vst.msk [vmem:[%s458_s3 + $0x20] sm:$0xff] %vm239_vm2, %v231_v43  ;;  %251 = vst.msk [vmem:[%s458_s3 + $0x50] sm:$0xff] %vm239_vm2, %v237_v44 }

</bundles_post_ra>
